<compile_context>
chip_gen: v5e
topology: v5e:2x2
jax: 0.10.0
libtpu: 0.0.40
codegen_flags: <defaults>
</compile_context>

<pallas_src>
import jax
import jax.numpy as jnp
from jax import lax
from jax.experimental import pallas as pl
from jax.experimental.pallas import tpu as pltpu
import numpy as np


def _round_up(x, m):
    return ((x + m - 1) // m) * m


def occ_decoder_kernel(
    x_ref,
    wx_stack, w1_1, w1_2, w1_3,
    b1_0, b1_1, b1_2, b1_3,
    w2h, w2_1, w2_2, w2_3,
    b2_0, b2_1, b2_2, b2_3,
    w3, b3,
    out_ref,
):
    H = w2h.shape[0]

    # x tile: (tm, D_in) f32 in natural layout; cast to bf16 in-kernel.
    x_bf = x_ref[...].astype(jnp.bfloat16)

    # Fused first MXU pass: [W1_0 ; W2_0[:D_in]^T] (2H, D_in) contracted against
    # x (tm, D_in) on the last dims -> (2H, tm) f32 (no explicit transpose).
    z = lax.dot_general(
        wx_stack[...], x_bf,
        dimension_numbers=(((1,), (1,)), ((), ())),
        preferred_element_type=jnp.float32,
    )

    def linear_relu_T(hT, w_ref, b_ref):
        # yT = W @ hT + b ; W stored (out_f, in_f) bf16, b stored (out_f, 1) f32.
        y = jnp.dot(w_ref[...], hT, preferred_element_type=jnp.float32)
        y = jnp.maximum(y + b_ref[...], 0.0)           # f32 bias-add + ReLU
        return y.astype(jnp.bfloat16)                  # bf16 for next MXU pass

    # block1 layer 0 comes from rows [0:H] of the fused dot.
    h = jnp.maximum(z[:H] + b1_0[...], 0.0).astype(jnp.bfloat16)
    skip_x = z[H:]                                     # x @ W2x^T, kept in f32

    # block1 layers 1..3
    h = linear_relu_T(h, w1_1, b1_1)
    h = linear_relu_T(h, w1_2, b1_2)
    h = linear_relu_T(h, w1_3, b1_3)

    # block2 layer 0 with skip:  relu(W2h @ h1^T + W2x @ x^T + b2_0)
    y = jnp.dot(w2h[...], h, preferred_element_type=jnp.float32) + skip_x + b2_0[...]
    h = jnp.maximum(y, 0.0).astype(jnp.bfloat16)

    # block2 layers 1..3
    h = linear_relu_T(h, w2_1, b2_1)
    h = linear_relu_T(h, w2_2, b2_2)
    h = linear_relu_T(h, w2_3, b2_3)

    # block3 + abs: (1, H) @ (H, tm) -> lane-dense (1, tm) output row.
    o = jnp.dot(w3[...], h, preferred_element_type=jnp.float32) + b3[...]
    out_ref[...] = jnp.abs(o)


def occ_decoder_forward(x, params, *, tm_desired=2048):
    """x: (B, N, D_in) float32 -> (B, N, 1) float32."""
    B, N, D_in = x.shape
    M = B * N
    (w1, b1, w2, b2, w3, b3) = params
    H = w1[0].shape[1]

    # ---- row tile: big (amortise per-step overhead / MXU weight loads), a
    # multiple of 128, and capped so the grid has >=2 steps whenever M permits
    # (keeps both v7x TensorCores busy via the "parallel" grid axis).
    n128 = _round_up(M, 128) // 128
    tm_blocks = max(1, min(max(1, tm_desired // 128), n128))
    if n128 >= 2:
        tm_blocks = min(tm_blocks, max(1, n128 // 2))
    tm = 128 * tm_blocks
    M_pad = _round_up(M, tm)
    grid = (M_pad // tm,)

    # Natural (M, D_in) layout; only ragged M pays a pad pass (no transpose/cast
    # pass in the wrapper any more -- that moved into the kernel).
    x2d = x.reshape(M, D_in)
    if M_pad != M:
        x2d = jnp.pad(x2d, ((0, M_pad - M), (0, 0)))

    bf = lambda a: a.astype(jnp.bfloat16)
    tW = lambda a: bf(a.T)                                   # (in,out) -> (out,in) bf16
    tb = lambda a: a.reshape(-1, 1).astype(jnp.float32)      # (1,H)   -> (H,1)   f32

    w2_0 = w2[0]
    # Stack the two weights that consume x into a single (2H, D_in) MXU pass:
    #   rows [0:H]  = W1_0^T          (block1 layer 0)
    #   rows [H:2H] = W2_0[:D_in]^T   (x-part of the skip layer)
    wx_stack = jnp.concatenate([tW(w1[0]), tW(w2_0[:D_in, :])], axis=0)

    weights = [
        wx_stack, tW(w1[1]), tW(w1[2]), tW(w1[3]),
        tb(b1[0]), tb(b1[1]), tb(b1[2]), tb(b1[3]),
        tW(w2_0[D_in:, :]), tW(w2[1]), tW(w2[2]), tW(w2[3]),
        tb(b2[0]), tb(b2[1]), tb(b2[2]), tb(b2[3]),
        bf(w3.T), b3.reshape(1, 1).astype(jnp.float32),
    ]

    # Constant index_map => weights are DMA'd once and stay VMEM-resident.
    full = lambda arr: pl.BlockSpec(arr.shape, lambda i: (0,) * arr.ndim)

    flops = 2 * M_pad * (2 * D_in * H + 7 * H * H + H)
    w_bytes = sum(int(w.size) * int(w.dtype.itemsize) for w in weights)
    cost = pl.CostEstimate(
        flops=int(flops),
        transcendentals=0,
        bytes_accessed=int(M_pad * D_in * 4 + M_pad * 4 + w_bytes),
    )

    out = pl.pallas_call(
        occ_decoder_kernel,
        out_shape=jax.ShapeDtypeStruct((1, M_pad), jnp.float32),
        grid_spec=pltpu.PrefetchScalarGridSpec(
            num_scalar_prefetch=0,
            grid=grid,
            in_specs=[pl.BlockSpec((tm, D_in), lambda i: (i, 0))]
                     + [full(w) for w in weights],
            out_specs=pl.BlockSpec((1, tm), lambda i: (0, i)),
        ),
        compiler_params=pltpu.CompilerParams(
            dimension_semantics=("parallel",)),
        cost_estimate=cost,
    )(x2d, *weights)

    return out[0, :M].reshape(B, N, 1)


def init_occ_decoder_params(key, input_size, hidden_dim):
    """Deterministic geo_init=True initialization (matches the torch module)."""
    skip_dim = hidden_dim + input_size
    std_hid = np.sqrt(2.0) / np.sqrt(hidden_dim)
    mean_out = 2.0 * np.sqrt(np.pi) / np.sqrt(hidden_dim)

    keys = jax.random.split(key, 9)

    def lin(k, fan_in, fan_out, mean, std):
        return mean + std * jax.random.normal(k, (fan_in, fan_out), jnp.float32)

    # block1
    w1 = [lin(keys[0], input_size, hidden_dim, 0.0, std_hid),
          lin(keys[1], hidden_dim, hidden_dim, 0.0, std_hid),
          lin(keys[2], hidden_dim, hidden_dim, 0.0, std_hid),
          lin(keys[3], hidden_dim, hidden_dim, 0.0, std_hid)]
    b1 = [jnp.zeros((1, hidden_dim), jnp.float32) for _ in range(4)]
    # block2 (first layer takes the skip concat)
    w2 = [lin(keys[4], skip_dim, hidden_dim, 0.0, std_hid),
          lin(keys[5], hidden_dim, hidden_dim, 0.0, std_hid),
          lin(keys[6], hidden_dim, hidden_dim, 0.0, std_hid),
          lin(keys[7], hidden_dim, hidden_dim, 0.0, std_hid)]
    b2 = [jnp.zeros((1, hidden_dim), jnp.float32) for _ in range(4)]
    # block3 (geo init)
    w3 = lin(keys[8], hidden_dim, 1, mean_out, 1e-6)
    b3 = jnp.full((1, 1), -0.5, jnp.float32)
    return (w1, b1, w2, b2, w3, b3)


def occ_decoder_ref(x, params):
    """Pure-JAX f32 reference of the torch forward (skip_connection=True, tanh_act=False)."""
    (w1, b1, w2, b2, w3, b3) = params
    h = x
    for w, b in zip(w1, b1):
        h = jnp.maximum(h @ w + b, 0.0)
    h = jnp.concatenate([x, h], axis=-1)
    for w, b in zip(w2, b2):
        h = jnp.maximum(h @ w + b, 0.0)
    return jnp.abs(h @ w3 + b3)


if __name__ == "__main__":
    # small shapes consistent with the module: latent_size=29 -> input_size=32
    B, N = 2, 8
    latent_size = 29
    input_size = latent_size + 3       # 32
    hidden_dim = 64

    key = jax.random.PRNGKey(0)
    kx, kp = jax.random.split(key)
    x = jax.random.normal(kx, (B, N, input_size), jnp.float32)
    params = init_occ_decoder_params(kp, input_size, hidden_dim)

    out = occ_decoder_forward(x, params)
    out = jax.block_until_ready(out)

    ref = occ_decoder_ref(x.reshape(B * N, input_size), params).reshape(B, N, 1)
    assert out.shape == (B, N, 1)
    # bf16 matmuls with f32 accumulation vs the f32 reference -> relaxed tolerance.
    np.testing.assert_allclose(np.asarray(out), np.asarray(ref), rtol=5e-2, atol=5e-2)

    print("KERNEL_OK")
</pallas_src>

<mosaic_0001>
module attributes {stable_mosaic.version = 11 : i64} {
  func.func @occ_decoder_kernel(%arg0: i32, %arg1: memref<128x32xf32, #tpu.memory_space<vmem>>, %arg2: memref<128x32xbf16, #tpu.memory_space<vmem>>, %arg3: memref<64x64xbf16, #tpu.memory_space<vmem>>, %arg4: memref<64x64xbf16, #tpu.memory_space<vmem>>, %arg5: memref<64x64xbf16, #tpu.memory_space<vmem>>, %arg6: memref<64x1xf32, #tpu.memory_space<vmem>>, %arg7: memref<64x1xf32, #tpu.memory_space<vmem>>, %arg8: memref<64x1xf32, #tpu.memory_space<vmem>>, %arg9: memref<64x1xf32, #tpu.memory_space<vmem>>, %arg10: memref<64x64xbf16, #tpu.memory_space<vmem>>, %arg11: memref<64x64xbf16, #tpu.memory_space<vmem>>, %arg12: memref<64x64xbf16, #tpu.memory_space<vmem>>, %arg13: memref<64x64xbf16, #tpu.memory_space<vmem>>, %arg14: memref<64x1xf32, #tpu.memory_space<vmem>>, %arg15: memref<64x1xf32, #tpu.memory_space<vmem>>, %arg16: memref<64x1xf32, #tpu.memory_space<vmem>>, %arg17: memref<64x1xf32, #tpu.memory_space<vmem>>, %arg18: memref<1x64xbf16, #tpu.memory_space<vmem>>, %arg19: memref<1x1xf32, #tpu.memory_space<vmem>>, %arg20: memref<1x128xf32, #tpu.memory_space<vmem>>) attributes {dimension_semantics = [#tpu.dimension_semantics<parallel>], iteration_bounds = array<i64: 1>, scalar_prefetch = 0 : i64, scratch_operands = 0 : i64, tpu.core_type = #tpu.core_type<tc>, window_params = [{transform_indices = @transform_0, window_bounds = array<i64: 128, 32>}, {pipeline_mode = #tpu.pipeline_mode<synchronous>, transform_indices = @transform_1, window_bounds = array<i64: 128, 32>}, {pipeline_mode = #tpu.pipeline_mode<synchronous>, transform_indices = @transform_2, window_bounds = array<i64: 64, 64>}, {pipeline_mode = #tpu.pipeline_mode<synchronous>, transform_indices = @transform_3, window_bounds = array<i64: 64, 64>}, {pipeline_mode = #tpu.pipeline_mode<synchronous>, transform_indices = @transform_4, window_bounds = array<i64: 64, 64>}, {pipeline_mode = #tpu.pipeline_mode<synchronous>, transform_indices = @transform_5, window_bounds = array<i64: 64, 1>}, {pipeline_mode = #tpu.pipeline_mode<synchronous>, transform_indices = @transform_6, window_bounds = array<i64: 64, 1>}, {pipeline_mode = #tpu.pipeline_mode<synchronous>, transform_indices = @transform_7, window_bounds = array<i64: 64, 1>}, {pipeline_mode = #tpu.pipeline_mode<synchronous>, transform_indices = @transform_8, window_bounds = array<i64: 64, 1>}, {pipeline_mode = #tpu.pipeline_mode<synchronous>, transform_indices = @transform_9, window_bounds = array<i64: 64, 64>}, {pipeline_mode = #tpu.pipeline_mode<synchronous>, transform_indices = @transform_10, window_bounds = array<i64: 64, 64>}, {pipeline_mode = #tpu.pipeline_mode<synchronous>, transform_indices = @transform_11, window_bounds = array<i64: 64, 64>}, {pipeline_mode = #tpu.pipeline_mode<synchronous>, transform_indices = @transform_12, window_bounds = array<i64: 64, 64>}, {pipeline_mode = #tpu.pipeline_mode<synchronous>, transform_indices = @transform_13, window_bounds = array<i64: 64, 1>}, {pipeline_mode = #tpu.pipeline_mode<synchronous>, transform_indices = @transform_14, window_bounds = array<i64: 64, 1>}, {pipeline_mode = #tpu.pipeline_mode<synchronous>, transform_indices = @transform_15, window_bounds = array<i64: 64, 1>}, {pipeline_mode = #tpu.pipeline_mode<synchronous>, transform_indices = @transform_16, window_bounds = array<i64: 64, 1>}, {pipeline_mode = #tpu.pipeline_mode<synchronous>, transform_indices = @transform_17, window_bounds = array<i64: 1, 64>}, {pipeline_mode = #tpu.pipeline_mode<synchronous>, transform_indices = @transform_18, window_bounds = array<i64: 1, 1>}, {transform_indices = @transform_19, window_bounds = array<i64: 1, 128>}]} {
    %c0 = arith.constant 0 : index
    %c0_0 = arith.constant 0 : index
    %0 = vector.load %arg1[%c0, %c0_0] : memref<128x32xf32, #tpu.memory_space<vmem>>, vector<128x32xf32>
    %1 = arith.truncf %0 : vector<128x32xf32> to vector<128x32xbf16>
    %c0_1 = arith.constant 0 : index
    %c0_2 = arith.constant 0 : index
    %2 = vector.load %arg2[%c0_1, %c0_2] : memref<128x32xbf16, #tpu.memory_space<vmem>>, vector<128x32xbf16>
    %cst = arith.constant dense<0.000000e+00> : vector<128x128xf32>
    %3 = tpu.matmul %2, %1, %cst {dimension_numbers = #tpu.dot_dimension_numbers<[1], [1], [0], [0], [0, 0, 1, 0], [], []>} : vector<128x32xbf16>, vector<128x32xbf16>, vector<128x128xf32> -> vector<128x128xf32>
    %4 = vector.extract_strided_slice %3 {offsets = [0, 0], sizes = [64, 128], strides = [1, 1]} : vector<128x128xf32> to vector<64x128xf32>
    %c0_3 = arith.constant 0 : index
    %c0_4 = arith.constant 0 : index
    %5 = vector.load %arg6[%c0_3, %c0_4] : memref<64x1xf32, #tpu.memory_space<vmem>>, vector<64x1xf32>
    %6 = vector.broadcast %5 : vector<64x1xf32> to vector<64x128xf32>
    %7 = arith.addf %4, %6 : vector<64x128xf32>
    %cst_5 = arith.constant 0.000000e+00 : f32
    %8 = vector.broadcast %cst_5 : f32 to vector<64x128xf32>
    %9 = arith.maximumf %7, %8 : vector<64x128xf32>
    %10 = arith.truncf %9 : vector<64x128xf32> to vector<64x128xbf16>
    %11 = vector.extract_strided_slice %3 {offsets = [64, 0], sizes = [64, 128], strides = [1, 1]} : vector<128x128xf32> to vector<64x128xf32>
    %c0_6 = arith.constant 0 : index
    %c0_7 = arith.constant 0 : index
    %12 = vector.load %arg3[%c0_6, %c0_7] : memref<64x64xbf16, #tpu.memory_space<vmem>>, vector<64x64xbf16>
    %cst_8 = arith.constant dense<0.000000e+00> : vector<64x128xf32>
    %13 = tpu.matmul %12, %10, %cst_8 {dimension_numbers = #tpu.dot_dimension_numbers<[1], [0], [0], [1], [0, 0, 1, 1], [], []>} : vector<64x64xbf16>, vector<64x128xbf16>, vector<64x128xf32> -> vector<64x128xf32>
    %c0_9 = arith.constant 0 : index
    %c0_10 = arith.constant 0 : index
    %14 = vector.load %arg7[%c0_9, %c0_10] : memref<64x1xf32, #tpu.memory_space<vmem>>, vector<64x1xf32>
    %15 = vector.broadcast %14 : vector<64x1xf32> to vector<64x128xf32>
    %16 = arith.addf %13, %15 : vector<64x128xf32>
    %cst_11 = arith.constant 0.000000e+00 : f32
    %17 = vector.broadcast %cst_11 : f32 to vector<64x128xf32>
    %18 = arith.maximumf %16, %17 : vector<64x128xf32>
    %19 = arith.truncf %18 : vector<64x128xf32> to vector<64x128xbf16>
    %c0_12 = arith.constant 0 : index
    %c0_13 = arith.constant 0 : index
    %20 = vector.load %arg4[%c0_12, %c0_13] : memref<64x64xbf16, #tpu.memory_space<vmem>>, vector<64x64xbf16>
    %cst_14 = arith.constant dense<0.000000e+00> : vector<64x128xf32>
    %21 = tpu.matmul %20, %19, %cst_14 {dimension_numbers = #tpu.dot_dimension_numbers<[1], [0], [0], [1], [0, 0, 1, 1], [], []>} : vector<64x64xbf16>, vector<64x128xbf16>, vector<64x128xf32> -> vector<64x128xf32>
    %c0_15 = arith.constant 0 : index
    %c0_16 = arith.constant 0 : index
    %22 = vector.load %arg8[%c0_15, %c0_16] : memref<64x1xf32, #tpu.memory_space<vmem>>, vector<64x1xf32>
    %23 = vector.broadcast %22 : vector<64x1xf32> to vector<64x128xf32>
    %24 = arith.addf %21, %23 : vector<64x128xf32>
    %cst_17 = arith.constant 0.000000e+00 : f32
    %25 = vector.broadcast %cst_17 : f32 to vector<64x128xf32>
    %26 = arith.maximumf %24, %25 : vector<64x128xf32>
    %27 = arith.truncf %26 : vector<64x128xf32> to vector<64x128xbf16>
    %c0_18 = arith.constant 0 : index
    %c0_19 = arith.constant 0 : index
    %28 = vector.load %arg5[%c0_18, %c0_19] : memref<64x64xbf16, #tpu.memory_space<vmem>>, vector<64x64xbf16>
    %cst_20 = arith.constant dense<0.000000e+00> : vector<64x128xf32>
    %29 = tpu.matmul %28, %27, %cst_20 {dimension_numbers = #tpu.dot_dimension_numbers<[1], [0], [0], [1], [0, 0, 1, 1], [], []>} : vector<64x64xbf16>, vector<64x128xbf16>, vector<64x128xf32> -> vector<64x128xf32>
    %c0_21 = arith.constant 0 : index
    %c0_22 = arith.constant 0 : index
    %30 = vector.load %arg9[%c0_21, %c0_22] : memref<64x1xf32, #tpu.memory_space<vmem>>, vector<64x1xf32>
    %31 = vector.broadcast %30 : vector<64x1xf32> to vector<64x128xf32>
    %32 = arith.addf %29, %31 : vector<64x128xf32>
    %cst_23 = arith.constant 0.000000e+00 : f32
    %33 = vector.broadcast %cst_23 : f32 to vector<64x128xf32>
    %34 = arith.maximumf %32, %33 : vector<64x128xf32>
    %35 = arith.truncf %34 : vector<64x128xf32> to vector<64x128xbf16>
    %c0_24 = arith.constant 0 : index
    %c0_25 = arith.constant 0 : index
    %36 = vector.load %arg10[%c0_24, %c0_25] : memref<64x64xbf16, #tpu.memory_space<vmem>>, vector<64x64xbf16>
    %cst_26 = arith.constant dense<0.000000e+00> : vector<64x128xf32>
    %37 = tpu.matmul %36, %35, %cst_26 {dimension_numbers = #tpu.dot_dimension_numbers<[1], [0], [0], [1], [0, 0, 1, 1], [], []>} : vector<64x64xbf16>, vector<64x128xbf16>, vector<64x128xf32> -> vector<64x128xf32>
    %38 = arith.addf %37, %11 : vector<64x128xf32>
    %c0_27 = arith.constant 0 : index
    %c0_28 = arith.constant 0 : index
    %39 = vector.load %arg14[%c0_27, %c0_28] : memref<64x1xf32, #tpu.memory_space<vmem>>, vector<64x1xf32>
    %40 = vector.broadcast %39 : vector<64x1xf32> to vector<64x128xf32>
    %41 = arith.addf %38, %40 : vector<64x128xf32>
    %cst_29 = arith.constant 0.000000e+00 : f32
    %42 = vector.broadcast %cst_29 : f32 to vector<64x128xf32>
    %43 = arith.maximumf %41, %42 : vector<64x128xf32>
    %44 = arith.truncf %43 : vector<64x128xf32> to vector<64x128xbf16>
    %c0_30 = arith.constant 0 : index
    %c0_31 = arith.constant 0 : index
    %45 = vector.load %arg11[%c0_30, %c0_31] : memref<64x64xbf16, #tpu.memory_space<vmem>>, vector<64x64xbf16>
    %cst_32 = arith.constant dense<0.000000e+00> : vector<64x128xf32>
    %46 = tpu.matmul %45, %44, %cst_32 {dimension_numbers = #tpu.dot_dimension_numbers<[1], [0], [0], [1], [0, 0, 1, 1], [], []>} : vector<64x64xbf16>, vector<64x128xbf16>, vector<64x128xf32> -> vector<64x128xf32>
    %c0_33 = arith.constant 0 : index
    %c0_34 = arith.constant 0 : index
    %47 = vector.load %arg15[%c0_33, %c0_34] : memref<64x1xf32, #tpu.memory_space<vmem>>, vector<64x1xf32>
    %48 = vector.broadcast %47 : vector<64x1xf32> to vector<64x128xf32>
    %49 = arith.addf %46, %48 : vector<64x128xf32>
    %cst_35 = arith.constant 0.000000e+00 : f32
    %50 = vector.broadcast %cst_35 : f32 to vector<64x128xf32>
    %51 = arith.maximumf %49, %50 : vector<64x128xf32>
    %52 = arith.truncf %51 : vector<64x128xf32> to vector<64x128xbf16>
    %c0_36 = arith.constant 0 : index
    %c0_37 = arith.constant 0 : index
    %53 = vector.load %arg12[%c0_36, %c0_37] : memref<64x64xbf16, #tpu.memory_space<vmem>>, vector<64x64xbf16>
    %cst_38 = arith.constant dense<0.000000e+00> : vector<64x128xf32>
    %54 = tpu.matmul %53, %52, %cst_38 {dimension_numbers = #tpu.dot_dimension_numbers<[1], [0], [0], [1], [0, 0, 1, 1], [], []>} : vector<64x64xbf16>, vector<64x128xbf16>, vector<64x128xf32> -> vector<64x128xf32>
    %c0_39 = arith.constant 0 : index
    %c0_40 = arith.constant 0 : index
    %55 = vector.load %arg16[%c0_39, %c0_40] : memref<64x1xf32, #tpu.memory_space<vmem>>, vector<64x1xf32>
    %56 = vector.broadcast %55 : vector<64x1xf32> to vector<64x128xf32>
    %57 = arith.addf %54, %56 : vector<64x128xf32>
    %cst_41 = arith.constant 0.000000e+00 : f32
    %58 = vector.broadcast %cst_41 : f32 to vector<64x128xf32>
    %59 = arith.maximumf %57, %58 : vector<64x128xf32>
    %60 = arith.truncf %59 : vector<64x128xf32> to vector<64x128xbf16>
    %c0_42 = arith.constant 0 : index
    %c0_43 = arith.constant 0 : index
    %61 = vector.load %arg13[%c0_42, %c0_43] : memref<64x64xbf16, #tpu.memory_space<vmem>>, vector<64x64xbf16>
    %cst_44 = arith.constant dense<0.000000e+00> : vector<64x128xf32>
    %62 = tpu.matmul %61, %60, %cst_44 {dimension_numbers = #tpu.dot_dimension_numbers<[1], [0], [0], [1], [0, 0, 1, 1], [], []>} : vector<64x64xbf16>, vector<64x128xbf16>, vector<64x128xf32> -> vector<64x128xf32>
    %c0_45 = arith.constant 0 : index
    %c0_46 = arith.constant 0 : index
    %63 = vector.load %arg17[%c0_45, %c0_46] : memref<64x1xf32, #tpu.memory_space<vmem>>, vector<64x1xf32>
    %64 = vector.broadcast %63 : vector<64x1xf32> to vector<64x128xf32>
    %65 = arith.addf %62, %64 : vector<64x128xf32>
    %cst_47 = arith.constant 0.000000e+00 : f32
    %66 = vector.broadcast %cst_47 : f32 to vector<64x128xf32>
    %67 = arith.maximumf %65, %66 : vector<64x128xf32>
    %68 = arith.truncf %67 : vector<64x128xf32> to vector<64x128xbf16>
    %c0_48 = arith.constant 0 : index
    %c0_49 = arith.constant 0 : index
    %69 = vector.load %arg18[%c0_48, %c0_49] : memref<1x64xbf16, #tpu.memory_space<vmem>>, vector<1x64xbf16>
    %cst_50 = arith.constant dense<0.000000e+00> : vector<1x128xf32>
    %70 = tpu.matmul %69, %68, %cst_50 {dimension_numbers = #tpu.dot_dimension_numbers<[1], [0], [0], [1], [0, 0, 1, 1], [], []>} : vector<1x64xbf16>, vector<64x128xbf16>, vector<1x128xf32> -> vector<1x128xf32>
    %c0_51 = arith.constant 0 : index
    %c0_52 = arith.constant 0 : index
    %71 = vector.load %arg19[%c0_51, %c0_52] : memref<1x1xf32, #tpu.memory_space<vmem>>, vector<1x1xf32>
    %72 = vector.broadcast %71 : vector<1x1xf32> to vector<1x128xf32>
    %73 = arith.addf %70, %72 : vector<1x128xf32>
    %74 = math.absf %73 : vector<1x128xf32>
    %c0_53 = arith.constant 0 : index
    %c0_54 = arith.constant 0 : index
    %75 = vector.load %arg20[%c0_53, %c0_54] : memref<1x128xf32, #tpu.memory_space<vmem>>, vector<1x128xf32>
    tpu.vector_store %arg20[%c0_53, %c0_54], %74 {strides = array<i32>} : memref<1x128xf32, #tpu.memory_space<vmem>>, vector<1x128xf32>,
    return
  }
  func.func @transform_0(%arg0: i32) -> (i32, i32) {
    %c0_i32 = arith.constant 0 : i32
    %c0_i32_0 = arith.constant 0 : i32
    return %arg0, %c0_i32 : i32, i32
  }
  func.func @transform_1(%arg0: i32) -> (i32, i32) {
    %c0_i32 = arith.constant 0 : i32
    %c0_i32_0 = arith.constant 0 : i32
    %c0_i32_1 = arith.constant 0 : i32
    return %c0_i32, %c0_i32_0 : i32, i32
  }
  func.func @transform_2(%arg0: i32) -> (i32, i32) {
    %c0_i32 = arith.constant 0 : i32
    %c0_i32_0 = arith.constant 0 : i32
    %c0_i32_1 = arith.constant 0 : i32
    return %c0_i32, %c0_i32_0 : i32, i32
  }
  func.func @transform_3(%arg0: i32) -> (i32, i32) {
    %c0_i32 = arith.constant 0 : i32
    %c0_i32_0 = arith.constant 0 : i32
    %c0_i32_1 = arith.constant 0 : i32
    return %c0_i32, %c0_i32_0 : i32, i32
  }
  func.func @transform_4(%arg0: i32) -> (i32, i32) {
    %c0_i32 = arith.constant 0 : i32
    %c0_i32_0 = arith.constant 0 : i32
    %c0_i32_1 = arith.constant 0 : i32
    return %c0_i32, %c0_i32_0 : i32, i32
  }
  func.func @transform_5(%arg0: i32) -> (i32, i32) {
    %c0_i32 = arith.constant 0 : i32
    %c0_i32_0 = arith.constant 0 : i32
    %c0_i32_1 = arith.constant 0 : i32
    return %c0_i32, %c0_i32_0 : i32, i32
  }
  func.func @transform_6(%arg0: i32) -> (i32, i32) {
    %c0_i32 = arith.constant 0 : i32
    %c0_i32_0 = arith.constant 0 : i32
    %c0_i32_1 = arith.constant 0 : i32
    return %c0_i32, %c0_i32_0 : i32, i32
  }
  func.func @transform_7(%arg0: i32) -> (i32, i32) {
    %c0_i32 = arith.constant 0 : i32
    %c0_i32_0 = arith.constant 0 : i32
    %c0_i32_1 = arith.constant 0 : i32
    return %c0_i32, %c0_i32_0 : i32, i32
  }
  func.func @transform_8(%arg0: i32) -> (i32, i32) {
    %c0_i32 = arith.constant 0 : i32
    %c0_i32_0 = arith.constant 0 : i32
    %c0_i32_1 = arith.constant 0 : i32
    return %c0_i32, %c0_i32_0 : i32, i32
  }
  func.func @transform_9(%arg0: i32) -> (i32, i32) {
    %c0_i32 = arith.constant 0 : i32
    %c0_i32_0 = arith.constant 0 : i32
    %c0_i32_1 = arith.constant 0 : i32
    return %c0_i32, %c0_i32_0 : i32, i32
  }
  func.func @transform_10(%arg0: i32) -> (i32, i32) {
    %c0_i32 = arith.constant 0 : i32
    %c0_i32_0 = arith.constant 0 : i32
    %c0_i32_1 = arith.constant 0 : i32
    return %c0_i32, %c0_i32_0 : i32, i32
  }
  func.func @transform_11(%arg0: i32) -> (i32, i32) {
    %c0_i32 = arith.constant 0 : i32
    %c0_i32_0 = arith.constant 0 : i32
    %c0_i32_1 = arith.constant 0 : i32
    return %c0_i32, %c0_i32_0 : i32, i32
  }
  func.func @transform_12(%arg0: i32) -> (i32, i32) {
    %c0_i32 = arith.constant 0 : i32
    %c0_i32_0 = arith.constant 0 : i32
    %c0_i32_1 = arith.constant 0 : i32
    return %c0_i32, %c0_i32_0 : i32, i32
  }
  func.func @transform_13(%arg0: i32) -> (i32, i32) {
    %c0_i32 = arith.constant 0 : i32
    %c0_i32_0 = arith.constant 0 : i32
    %c0_i32_1 = arith.constant 0 : i32
    return %c0_i32, %c0_i32_0 : i32, i32
  }
  func.func @transform_14(%arg0: i32) -> (i32, i32) {
    %c0_i32 = arith.constant 0 : i32
    %c0_i32_0 = arith.constant 0 : i32
    %c0_i32_1 = arith.constant 0 : i32
    return %c0_i32, %c0_i32_0 : i32, i32
  }
  func.func @transform_15(%arg0: i32) -> (i32, i32) {
    %c0_i32 = arith.constant 0 : i32
    %c0_i32_0 = arith.constant 0 : i32
    %c0_i32_1 = arith.constant 0 : i32
    return %c0_i32, %c0_i32_0 : i32, i32
  }
  func.func @transform_16(%arg0: i32) -> (i32, i32) {
    %c0_i32 = arith.constant 0 : i32
    %c0_i32_0 = arith.constant 0 : i32
    %c0_i32_1 = arith.constant 0 : i32
    return %c0_i32, %c0_i32_0 : i32, i32
  }
  func.func @transform_17(%arg0: i32) -> (i32, i32) {
    %c0_i32 = arith.constant 0 : i32
    %c0_i32_0 = arith.constant 0 : i32
    %c0_i32_1 = arith.constant 0 : i32
    return %c0_i32, %c0_i32_0 : i32, i32
  }
  func.func @transform_18(%arg0: i32) -> (i32, i32) {
    %c0_i32 = arith.constant 0 : i32
    %c0_i32_0 = arith.constant 0 : i32
    %c0_i32_1 = arith.constant 0 : i32
    return %c0_i32, %c0_i32_0 : i32, i32
  }
  func.func @transform_19(%arg0: i32) -> (i32, i32) {
    %c0_i32 = arith.constant 0 : i32
    %c0_i32_0 = arith.constant 0 : i32
    return %c0_i32, %arg0 : i32, i32
  }
}

</mosaic_0001>

<bundles_post_ra>
// kernel: tpu_custom_call.1
= control target key start
LH: loop header
LB: loop body
LE: loop exit
PB: predicated region body
PF: predicated region fallthrough
CT: control target
= control target key end

     0   :  { %s2022_s0 = inlined_call_operand.vmem [shape: f32[128,32], index: 0, kind: input, shape index: {}]   ;;  %s2023_s1 = inlined_call_operand.vmem [shape: bf16[128,32], index: 1, kind: input, shape index: {}]   ;;  %s2024_s2 = inlined_call_operand.vmem [shape: bf16[64,64], index: 2, kind: input, shape index: {}]   ;;  %s2025_s3 = inlined_call_operand.vmem [shape: bf16[64,64], index: 3, kind: input, shape index: {}]   ;;  %s2026_s4 = inlined_call_operand.vmem [shape: bf16[64,64], index: 4, kind: input, shape index: {}]   ;;  %s2027_s5 = inlined_call_operand.vmem [shape: f32[64,1], index: 5, kind: input, shape index: {}]   ;;  %s2028_s6 = inlined_call_operand.vmem [shape: f32[64,1], index: 6, kind: input, shape index: {}]   ;;  %s2029_s7 = inlined_call_operand.vmem [shape: f32[64,1], index: 7, kind: input, shape index: {}]   ;;  %s2030_s8 = inlined_call_operand.vmem [shape: f32[64,1], index: 8, kind: input, shape index: {}]   ;;  %s2031_s9 = inlined_call_operand.vmem [shape: bf16[64,64], index: 9, kind: input, shape index: {}]   ;;  %s2032_s10 = inlined_call_operand.vmem [shape: bf16[64,64], index: 10, kind: input, shape index: {}]   ;;  %s2033_s11 = inlined_call_operand.vmem [shape: bf16[64,64], index: 11, kind: input, shape index: {}]   ;;  %s2034_s12 = inlined_call_operand.vmem [shape: bf16[64,64], index: 12, kind: input, shape index: {}]   ;;  %s2035_s13 = inlined_call_operand.vmem [shape: f32[64,1], index: 13, kind: input, shape index: {}]   ;;  %s2036_s14 = inlined_call_operand.vmem [shape: f32[64,1], index: 14, kind: input, shape index: {}]   ;;  %s2037_s15 = inlined_call_operand.vmem [shape: f32[64,1], index: 15, kind: input, shape index: {}]   ;;  %s2038_s16 = inlined_call_operand.vmem [shape: f32[64,1], index: 16, kind: input, shape index: {}]   ;;  %s2039_s17 = inlined_call_operand.vmem [shape: bf16[1,64], index: 17, kind: input, shape index: {}]   ;;  %s2040_s18 = inlined_call_operand.<no memory space> [shape: f32[1,1], index: 18, kind: input, shape index: {}]   ;;  %s2041_s19 = inlined_call_operand.hbm [shape: f32[1,128], index: 19, kind: output, shape index: {}]  }
   0x1   :  { %2046 = sst [smem:[#allocation6_spill]] %s2022_s0  ;;  %v24_v0 = vstv %s2040_s18 }
   0x2   :  { %2047 = sst [smem:[#allocation7_spill]] %s2023_s1  ;;  %25 = vst [vmem:[#allocation2] sm:$0x1] %v24_v0 }
   0x3   :  { %2048 = sst [smem:[#allocation8_spill]] %s2024_s2 }
   0x4   :  { %2049 = sst [smem:[#allocation9_spill]] %s2025_s3 }
   0x5   :  { %v250_v1 = vld [vmem:[%s2027_s5 + $0x30] sm:$0xff]  ;;  %v248_v2 = vld [vmem:[%s2027_s5 + $0x20] sm:$0xff]  ;;  %v1518_v4 = vmov 0   ;;  %s2050_s3 = sld [smem:[#allocation6_spill]]  ;;  %vm146_vm0 = vcmask 261120   ;;  %v249_v12 = vld [vmem:[%s2027_s5 + $0x28] sm:$0xff] }
   0x6   :  { %v246_v3 = vld [vmem:[%s2027_s5 + $0x10] sm:$0xff]  ;;  %1491 = vset.pattern.permute.xlu2 %v1518_v4  ;;  %1490 = vset.pattern.permute.xlu1 %v1518_v4  ;;  %v251_v13 = vld [vmem:[%s2027_s5 + $0x38] sm:$0xff] }
   0x7   :  { %1489 = vset.pattern.permute.xlu0 %v1518_v4  ;;  %274 = vperm.xlu1 %1490, %v248_v2   ;;  %v247_v14 = vld [vmem:[%s2027_s5 + $0x18] sm:$0xff] }
   0x8   :  { %284 = vperm.xlu0 %1489, %v250_v1   ;;  %264 = vperm.xlu2 %1491, %v246_v3  }
   0xb   :  { %v80_v5 = vld [vmem:[%s2050_s3 + $0x70] sm:$0xff]  ;;  %v81_v6 = vld [vmem:[%s2050_s3 + $0x78] sm:$0xff]  ;;  %v78_v8 = vld [vmem:[%s2050_s3 + $0x60] sm:$0xff] }
   0xc   :  { %v89_v7 = vpack.c.bf16 %v81_v6, %v80_v5  ;;  %v79_v9 = vld [vmem:[%s2050_s3 + $0x68] sm:$0xff] }
   0xd   :  { %v88_v11 = vpack.c.bf16 %v79_v9, %v78_v8 }
   0xe   :  { %v193_v10 = vsel %vm146_vm0, %v89_v7, 0 }
   0xf   :  { %195 = vmatpush.bf16.xpose.msra.mxu0 %v193_v10 }
  0x10   :  { %26 = vsyncpa [#allocation4], 0  ;;  %279 = vperm.xlu1 %1490, %v249_v12   ;;  %v190_v15 = vsel %vm146_vm0, %v88_v11, 0  ;;  %289 = vperm.xlu0 %1489, %v251_v13   ;;  %v76_v16 = vld [vmem:[%s2050_s3 + $0x50] sm:$0xff]  ;;  %v77_v17 = vld [vmem:[%s2050_s3 + $0x58] sm:$0xff]  ;;  %s2052_s25 = sld [smem:[#allocation8_spill]] }
  0x11   :  { %269 = vperm.xlu2 %1491, %v247_v14   ;;  %v87_v18 = vpack.c.bf16 %v77_v17, %v76_v16  ;;  %v245_v19 = vld [vmem:[%s2027_s5 + $0x8] sm:$0xff]  ;;  %v326_v20 = vld [vmem:[%s2028_s6 + $0x30] sm:$0xff]  ;;  %v244_v21 = vld [vmem:[%s2027_s5] sm:$0xff]  ;;  %s2051_s5 = sld [smem:[#allocation7_spill]]  ;;  %vm388_vm1 = vcmask 523264   ;;  %s1519_s1 = smov [#allocation3]  }
  0x12   :  { %v74_v23 = vld [vmem:[%s2050_s3 + $0x40] sm:$0xff]  ;;  %v75_v24 = vld [vmem:[%s2050_s3 + $0x48] sm:$0xff]  ;;  %v327_v28 = vld [vmem:[%s2028_s6 + $0x38] sm:$0xff]  ;;  %s2053_s30 = sld [smem:[#allocation9_spill]] }
  0x13   :  { %v187_v22 = vsel %vm146_vm0, %v87_v18, 0  ;;  %v86_v25 = vpack.c.bf16 %v75_v24, %v74_v23  ;;  %v324_v26 = vld [vmem:[%s2028_s6 + $0x20] sm:$0xff]  ;;  %v325_v27 = vld [vmem:[%s2028_s6 + $0x28] sm:$0xff]  ;;  %v72_v30 = vld [vmem:[%s2050_s3 + $0x30] sm:$0xff] }
  0x14   :  { %v73_v31 = vld [vmem:[%s2050_s3 + $0x38] sm:$0xff]  ;;  %v320_v34 = vld [vmem:[%s2028_s6] sm:$0xff]  ;;  %v322_v35 = vld [vmem:[%s2028_s6 + $0x10] sm:$0xff] }
  0x15   :  { %v184_v29 = vsel %vm146_vm0, %v86_v25, 0  ;;  %v85_v32 = vpack.c.bf16 %v73_v31, %v72_v30  ;;  %v323_v33 = vld [vmem:[%s2028_s6 + $0x18] sm:$0xff]  ;;  %v70_v37 = vld [vmem:[%s2050_s3 + $0x20] sm:$0xff]  ;;  %v71_v38 = vld [vmem:[%s2050_s3 + $0x28] sm:$0xff] }
  0x16   :  { %v84_v39 = vpack.c.bf16 %v71_v38, %v70_v37  ;;  %v456_v40 = vld [vmem:[%s2029_s7 + $0x30] sm:$0xff]  ;;  %v457_v41 = vld [vmem:[%s2029_s7 + $0x38] sm:$0xff]  ;;  %v321_v42 = vld [vmem:[%s2028_s6 + $0x8] sm:$0xff] }
  0x17   :  { %196 = vmatpush.bf16.xpose.msra.mxu0 %v190_v15  ;;  %v181_v36 = vsel %vm146_vm0, %v85_v32, 0  ;;  %v68_v44 = vld [vmem:[%s2050_s3 + $0x10] sm:$0xff]  ;;  %v69_v45 = vld [vmem:[%s2050_s3 + $0x18] sm:$0xff]  ;;  %v455_v47 = vld [vmem:[%s2029_s7 + $0x28] sm:$0xff] }
  0x18   :  { %259 = vperm.xlu1 %1490, %v245_v19   ;;  %254 = vperm.xlu0 %1489, %v244_v21   ;;  %v178_v43 = vsel %vm146_vm0, %v84_v39, 0  ;;  %v83_v46 = vpack.c.bf16 %v69_v45, %v68_v44  ;;  %v452_v48 = vld [vmem:[%s2029_s7 + $0x10] sm:$0xff]  ;;  %v454_v49 = vld [vmem:[%s2029_s7 + $0x20] sm:$0xff]  ;;  %v67_v52 = vld [vmem:[%s2050_s3 + $0x8] sm:$0xff] }
  0x19   :  { %360 = vperm.xlu2 %1491, %v326_v20   ;;  %v66_v51 = vld [vmem:[%s2050_s3] sm:$0xff]  ;;  %v451_v55 = vld [vmem:[%s2029_s7 + $0x8] sm:$0xff]  ;;  %v453_v56 = vld [vmem:[%s2029_s7 + $0x18] sm:$0xff] }
  0x1a   :  { %v175_v50 = vsel %vm146_vm0, %v83_v46, 0  ;;  %v82_v53 = vpack.c.bf16 %v67_v52, %v66_v51  ;;  %v450_v54 = vld [vmem:[%s2029_s7] sm:$0xff]  ;;  %v586_v58 = vld [vmem:[%s2030_s8 + $0x38] sm:$0xff]  ;;  %v585_v60 = vld [vmem:[%s2030_s8 + $0x30] sm:$0xff] }
  0x1b   :  { %v583_v59 = vld [vmem:[%s2030_s8 + $0x20] sm:$0xff]  ;;  %v581_v62 = vld [vmem:[%s2030_s8 + $0x10] sm:$0xff]  ;;  %v582_v63 = vld [vmem:[%s2030_s8 + $0x18] sm:$0xff] }
  0x1c   :  { %v172_v57 = vsel %vm146_vm0, %v82_v53, 0  ;;  %v1447_v61 = vld [vmem:[%s2051_s5] sm:$0xff]  ;;  %v584_v0 = vld [vmem:[%s2030_s8 + $0x28] sm:$0xff]  ;;  %v775_v2 = vld [vmem:[%s2035_s13 + $0x30] sm:$0xff] }
  0x1d   :  { %v580_v1 = vld [vmem:[%s2030_s8 + $0x8] sm:$0xff]  ;;  %v579_v3 = vld [vmem:[%s2030_s8] sm:$0xff]  ;;  %v776_v7 = vld [vmem:[%s2035_s13 + $0x38] sm:$0xff] }
  0x1e   :  { %v1448_v4 = vld [vmem:[%s2051_s5 + $0x8] sm:$0xff]  ;;  %v773_v5 = vld [vmem:[%s2035_s13 + $0x20] sm:$0xff]  ;;  %v772_v8 = vld [vmem:[%s2035_s13 + $0x18] sm:$0xff] }
  0x1f   :  { %197 = vmatpush.bf16.xpose.msra.mxu0 %v187_v22  ;;  %v774_v6 = vld [vmem:[%s2035_s13 + $0x28] sm:$0xff]  ;;  %v769_v9 = vld [vmem:[%s2035_s13] sm:$0xff]  ;;  %v771_v10 = vld [vmem:[%s2035_s13 + $0x10] sm:$0xff] }
  0x20   :  { %350 = vperm.xlu1 %1490, %v324_v26   ;;  %365 = vperm.xlu0 %1489, %v327_v28   ;;  %v1449_v11 = vld [vmem:[%s2051_s5 + $0x10] sm:$0xff]  ;;  %v852_v13 = vld [vmem:[%s2036_s14 + $0x38] sm:$0xff]  ;;  %v770_v14 = vld [vmem:[%s2035_s13 + $0x8] sm:$0xff] }
  0x21   :  { %355 = vperm.xlu2 %1491, %v325_v27   ;;  %v851_v12 = vld [vmem:[%s2036_s14 + $0x30] sm:$0xff]  ;;  %v850_v15 = vld [vmem:[%s2036_s14 + $0x28] sm:$0xff]  ;;  %v849_v17 = vld [vmem:[%s2036_s14 + $0x20] sm:$0xff] }
  0x22   :  { %v847_v16 = vld [vmem:[%s2036_s14 + $0x10] sm:$0xff]  ;;  %v1450_v18 = vld [vmem:[%s2051_s5 + $0x18] sm:$0xff]  ;;  %v845_v19 = vld [vmem:[%s2036_s14] sm:$0xff] }
  0x23   :  { %v846_v20 = vld [vmem:[%s2036_s14 + $0x8] sm:$0xff]  ;;  %v848_v21 = vld [vmem:[%s2036_s14 + $0x18] sm:$0xff]  ;;  %v978_v23 = vld [vmem:[%s2037_s15 + $0x20] sm:$0xff] }
  0x24   :  { %v981_v22 = vld [vmem:[%s2037_s15 + $0x38] sm:$0xff]  ;;  %v980_v24 = vld [vmem:[%s2037_s15 + $0x30] sm:$0xff]  ;;  %v979_v27 = vld [vmem:[%s2037_s15 + $0x28] sm:$0xff] }
  0x25   :  { %v976_v25 = vld [vmem:[%s2037_s15 + $0x10] sm:$0xff]  ;;  %v977_v26 = vld [vmem:[%s2037_s15 + $0x18] sm:$0xff]  ;;  %v975_v28 = vld [vmem:[%s2037_s15 + $0x8] sm:$0xff] }
  0x26   :  { %v974_v30 = vld [vmem:[%s2037_s15] sm:$0xff]  ;;  %v1108_v32 = vld [vmem:[%s2038_s16 + $0x28] sm:$0xff]  ;;  %s1255_s15 = sshll.u32 %s1519_s1, 4  ;;  %s1256_s15 = int_to_ptr.vmem [resolvable:$true] %s1255_s15 }
  0x27   :  { %198 = vmatpush.bf16.xpose.msra.mxu0 %v184_v29  ;;  %v1109_v29 = vld [vmem:[%s2038_s16 + $0x30] sm:$0xff]  ;;  %v1107_v31 = vld [vmem:[%s2038_s16 + $0x20] sm:$0xff]  ;;  %v1104_v38 = vld [vmem:[%s2038_s16 + $0x8] sm:$0xff] }
  0x28   :  { %345 = vperm.xlu1 %1490, %v323_v33   ;;  %340 = vperm.xlu0 %1489, %v322_v35   ;;  %v1110_v33 = vld [vmem:[%s2038_s16 + $0x38] sm:$0xff]  ;;  %v1103_v35 = vld [vmem:[%s2038_s16] sm:$0xff] }
  0x29   :  { %330 = vperm.xlu2 %1491, %v320_v34   ;;  %v1106_v34 = vld [vmem:[%s2038_s16 + $0x18] sm:$0xff]  ;;  %v1225_v37 = vld [vmem:[#allocation2] sm:$0x1] }
  0x2f   :  { %199 = vmatpush.bf16.xpose.msra.mxu0 %v181_v36  ;;  %v1105_v36 = vld [vmem:[%s2038_s16 + $0x10] sm:$0xff] }
  0x30   :  { %490 = vperm.xlu1 %1490, %v456_v40   ;;  %335 = vperm.xlu0 %1489, %v321_v42  }
  0x31   :  { %495 = vperm.xlu2 %1491, %v457_v41  }
  0x37   :  { %200 = vmatpush.bf16.xpose.msra.mxu0 %v178_v43 }
  0x38   :  { %485 = vperm.xlu1 %1490, %v455_v47   ;;  %480 = vperm.xlu0 %1489, %v454_v49  }
  0x39   :  { %470 = vperm.xlu2 %1491, %v452_v48  }
  0x3f   :  { %201 = vmatpush.bf16.xpose.msra.mxu0 %v175_v50 }
  0x40   :  { %460 = vperm.xlu1 %1490, %v450_v54   ;;  %475 = vperm.xlu0 %1489, %v453_v56  }
  0x41   :  { %465 = vperm.xlu2 %1491, %v451_v55  }
  0x47   :  { %202 = vmatpush.bf16.xpose.msra.mxu0 %v172_v57 }
  0x48   :  { %624 = vperm.xlu1 %1490, %v586_v58   ;;  %619 = vperm.xlu0 %1489, %v585_v60  }
  0x49   :  { %609 = vperm.xlu2 %1491, %v583_v59  }
  0x4e   :  { %1298 = vmatmul.msk.bf16.vlgmr.msra.gmra.mxu0 %vm146_vm0, %v1447_v61 }
  0x50   :  { %599 = vperm.xlu1 %1490, %v581_v62   ;;  %614 = vperm.xlu0 %1489, %v584_v0  }
  0x51   :  { %604 = vperm.xlu2 %1491, %v582_v63  }
  0x58   :  { %594 = vperm.xlu1 %1490, %v580_v1   ;;  %589 = vperm.xlu0 %1489, %v579_v3  }
  0x59   :  { %809 = vperm.xlu2 %1491, %v775_v2  }
  0x5e   :  { %1299 = vmatmul.msk.bf16.gmra.mxu0 %vm146_vm0, %v1448_v4 }
  0x60   :  { %799 = vperm.xlu1 %1490, %v773_v5   ;;  %814 = vperm.xlu0 %1489, %v776_v7  }
  0x61   :  { %804 = vperm.xlu2 %1491, %v774_v6  }
  0x62   :  { %v265_v48 = vpop.permute.xlu2 %264 }
  0x68   :  { %794 = vperm.xlu1 %1490, %v772_v8   ;;  %789 = vperm.xlu0 %1489, %v771_v10  }
  0x69   :  { %779 = vperm.xlu2 %1491, %v769_v9  }
  0x6b   :  { %v270_v58 = vpop.permute.xlu2 %269 }
  0x6e   :  { %1300 = vmatmul.msk.bf16.gmra.mxu0 %vm146_vm0, %v1449_v11  ;;  %v1455_v11 = vld [vmem:[%s2052_s25] sm:$0xff] }
  0x70   :  { %885 = vperm.xlu1 %1490, %v851_v12   ;;  %784 = vperm.xlu0 %1489, %v770_v14   ;;  %v1457_v12 = vld [vmem:[%s2052_s25 + $0x10] sm:$0xff]  ;;  %v1458_v14 = vld [vmem:[%s2052_s25 + $0x18] sm:$0xff] }
  0x71   :  { %890 = vperm.xlu2 %1491, %v852_v13   ;;  %v1456_v13 = vld [vmem:[%s2052_s25 + $0x8] sm:$0xff] }
  0x78   :  { %880 = vperm.xlu1 %1490, %v850_v15   ;;  %875 = vperm.xlu0 %1489, %v849_v17  }
  0x79   :  { %865 = vperm.xlu2 %1491, %v847_v16   ;;  %v275_v45 = vpop.permute.xlu1 %274 }
  0x7a   :  { %v285_v46 = vpop.permute.xlu0 %284 }
  0x7e   :  { %1301 = vmatmul.msk.bf16.gmra.mxu0 %vm146_vm0, %v1450_v18 }
  0x80   :  { %855 = vperm.xlu1 %1490, %v845_v19   ;;  %870 = vperm.xlu0 %1489, %v848_v21  }
  0x81   :  { %860 = vperm.xlu2 %1491, %v846_v20   ;;  %v361_v20 = vpop.permute.xlu2 %360 }
  0x82   :  { %v280_v49 = vpop.permute.xlu1 %279  ;;  %v290_v51 = vpop.permute.xlu0 %289 }
  0x88   :  { %1019 = vperm.xlu1 %1490, %v981_v22   ;;  %1014 = vperm.xlu0 %1489, %v980_v24  }
  0x89   :  { %1004 = vperm.xlu2 %1491, %v978_v23  }
  0x8a   :  { %v260_v0 = vpop.permute.xlu1 %259  ;;  %v255_v4 = vpop.permute.xlu0 %254 }
  0x90   :  { %994 = vperm.xlu1 %1490, %v976_v25   ;;  %1009 = vperm.xlu0 %1489, %v979_v27  }
  0x91   :  { %999 = vperm.xlu2 %1491, %v977_v26   ;;  %v356_v26 = vpop.permute.xlu2 %355 }
  0x92   :  { %v366_v19 = vpop.permute.xlu0 %365  ;;  %v351_v23 = vpop.permute.xlu1 %350 }
  0x98   :  { %989 = vperm.xlu1 %1490, %v975_v28   ;;  %984 = vperm.xlu0 %1489, %v974_v30  }
  0x99   :  { %1143 = vperm.xlu2 %1491, %v1109_v29  }
  0x9a   :  { %v341_v24 = vpop.permute.xlu0 %340 }
  0xa0   :  { %1133 = vperm.xlu1 %1490, %v1107_v31   ;;  %1148 = vperm.xlu0 %1489, %v1110_v33  }
  0xa1   :  { %1138 = vperm.xlu2 %1491, %v1108_v32  }
  0xa8   :  { %1128 = vperm.xlu1 %1490, %v1106_v34   ;;  %1123 = vperm.xlu0 %1489, %v1105_v36   ;;  %v346_v34 = vpop.permute.xlu1 %345 }
  0xa9   :  { %1113 = vperm.xlu2 %1491, %v1103_v35  }
  0xb0   :  { %1228 = vperm.xlu1 %1490, %v1225_v37   ;;  %1118 = vperm.xlu0 %1489, %v1104_v38  }
  0xcb   :  { %v204_v39 = vpop.f32.mrf.mxu0 }
  0xcc   :  { %v292_v5 = vadd.f32 %v255_v4, %v204_v39 }
  0xce   :  { %v300_v9 = vmax.f32 %v292_v5, 0.0 }
  0xd3   :  { %v206_v40 = vpop.f32.mrf.mxu0 }
  0xd4   :  { %v293_v1 = vadd.f32 %v260_v0, %v206_v40  ;;  %v336_v40 = vpop.permute.xlu0 %335 }
  0xd6   :  { %v301_v7 = vmax.f32 %v293_v1, 0.0 }
  0xd8   :  { %v308_v10 = vpack.c.bf16 %v301_v7, %v300_v9 }
  0xdb   :  { %v209_v41 = vpop.f32.mrf.mxu0 }
  0xdc   :  { %v294_v62 = vadd.f32 %v265_v48, %v209_v41  ;;  %v481_v0 = vpop.permute.xlu0 %480 }
  0xde   :  { %v302_v6 = vmax.f32 %v294_v62, 0.0  ;;  %v491_v62 = vpop.permute.xlu1 %490 }
  0xe3   :  { %v211_v42 = vpop.f32.mrf.mxu0 }
  0xe4   :  { %v295_v59 = vadd.f32 %v270_v58, %v211_v42 }
  0xe6   :  { %v303_v2 = vmax.f32 %v295_v59, 0.0 }
  0xe8   :  { %v309_v8 = vpack.c.bf16 %v303_v2, %v302_v6 }
  0xeb   :  { %v214_v43 = vpop.f32.mrf.mxu0 }
  0xec   :  { %v296_v55 = vadd.f32 %v275_v45, %v214_v43 }
  0xee   :  { %v304_v63 = vmax.f32 %v296_v55, 0.0 }
  0xf3   :  { %v216_v44 = vpop.f32.mrf.mxu0 }
  0xf4   :  { %v297_v53 = vadd.f32 %v280_v49, %v216_v44  ;;  %v331_v44 = vpop.permute.xlu2 %330 }
  0xf6   :  { %v305_v60 = vmax.f32 %v297_v53, 0.0  ;;  %v1461_v53 = vld [vmem:[%s2053_s30 + $0x10] sm:$0xff] }
  0xf8   :  { %v310_v3 = vpack.c.bf16 %v305_v60, %v304_v63 }
  0xfb   :  { %v219_v47 = vpop.f32.mrf.mxu0 }
  0xfc   :  { %v298_v50 = vadd.f32 %v285_v46, %v219_v47 }
  0xfe   :  { %v306_v56 = vmax.f32 %v298_v50, 0.0 }
 0x103   :  { %v221_v52 = vpop.f32.mrf.mxu0 }
 0x104   :  { %v299_v54 = vadd.f32 %v290_v51, %v221_v52  ;;  %v1459_v51 = vld [vmem:[%s2053_s30] sm:$0xff]  ;;  %v1460_v52 = vld [vmem:[%s2053_s30 + $0x8] sm:$0xff] }
 0x106   :  { %v307_v57 = vmax.f32 %v299_v54, 0.0  ;;  %v1462_v54 = vld [vmem:[%s2053_s30 + $0x18] sm:$0xff] }
 0x108   :  { %v311_v61 = vpack.c.bf16 %v307_v57, %v306_v56 }
 0x10a   :  { %405 = vmatpush.bf16.msra.mxu1 %v311_v61  ;;  %1483 = vmatpush.bf16.msra.mxu3 %v311_v61  ;;  %v496_v61 = vpop.permute.xlu2 %495 }
 0x10e   :  { %406 = vmatpush.bf16.msra.mxu1 %v310_v3  ;;  %1484 = vmatpush.bf16.msra.mxu3 %v310_v3  ;;  %v486_v3 = vpop.permute.xlu1 %485 }
 0x112   :  { %407 = vmatpush.bf16.msra.mxu1 %v309_v8  ;;  %1485 = vmatpush.bf16.msra.mxu3 %v309_v8  ;;  %v471_v1 = vpop.permute.xlu2 %470 }
 0x116   :  { %408 = vmatpush.bf16.msra.mxu1 %v308_v10  ;;  %1486 = vmatpush.bf16.msra.mxu3 %v308_v10  ;;  %v476_v10 = vpop.permute.xlu0 %475 }
 0x119   :  { %1322 = vmatmul.msk.bf16.vlgmr.msra.gmra.mxu1 %vm388_vm1, %v1455_v11  ;;  %1324 = vmatmul.msk.bf16.vlgmr.msra.gmra.mxu3 %vm388_vm1, %v1457_v12 }
 0x129   :  { %1323 = vmatmul.msk.bf16.gmra.mxu1 %vm388_vm1, %v1456_v13  ;;  %1325 = vmatmul.msk.bf16.gmra.mxu3 %vm388_vm1, %v1458_v14 }
 0x196   :  { %v410_v15 = vpop.f32.mrf.mxu1 }
 0x197   :  { %v411_v45 = vadd.f32 %v410_v15, %v331_v44 }
 0x199   :  { %v430_v49 = vmax.f32 %v411_v45, 0.0 }
 0x19c   :  { %v420_v16 = vpop.f32.mrf.mxu3 }
 0x19d   :  { %v421_v31 = vadd.f32 %v420_v16, %v351_v23  ;;  %v466_v16 = vpop.permute.xlu2 %465 }
 0x19e   :  { %v412_v17 = vpop.f32.mrf.mxu1 }
 0x19f   :  { %v434_v38 = vmax.f32 %v421_v31, 0.0  ;;  %v413_v41 = vadd.f32 %v412_v17, %v336_v40 }
 0x1a1   :  { %v431_v47 = vmax.f32 %v413_v41, 0.0  ;;  %v1452_v41 = vld [vmem:[%s2051_s5 + $0x28] sm:$0xff] }
 0x1a3   :  { %v438_v50 = vpack.c.bf16 %v431_v47, %v430_v49 }
 0x1a4   :  { %v422_v18 = vpop.f32.mrf.mxu3 }
 0x1a5   :  { %v423_v28 = vadd.f32 %v422_v18, %v356_v26 }
 0x1a6   :  { %v415_v21 = vpop.f32.mrf.mxu1 }
 0x1a7   :  { %v435_v35 = vmax.f32 %v423_v28, 0.0  ;;  %v416_v39 = vadd.f32 %v415_v21, %v341_v24  ;;  %v1464_v28 = vld [vmem:[%s2026_s4 + $0x8] sm:$0xff] }
 0x1a9   :  { %v440_v43 = vpack.c.bf16 %v435_v35, %v434_v38  ;;  %v432_v46 = vmax.f32 %v416_v39, 0.0  ;;  %v620_v39 = vpop.permute.xlu0 %619 }
 0x1ac   :  { %v425_v22 = vpop.f32.mrf.mxu3 }
 0x1ad   :  { %v426_v25 = vadd.f32 %v425_v22, %v361_v20  ;;  %v461_v20 = vpop.permute.xlu1 %460 }
 0x1ae   :  { %v417_v30 = vpop.f32.mrf.mxu1 }
 0x1af   :  { %v436_v32 = vmax.f32 %v426_v25, 0.0  ;;  %v418_v36 = vadd.f32 %v417_v30, %v346_v34  ;;  %v1466_v30 = vld [vmem:[%s2026_s4 + $0x18] sm:$0xff] }
 0x1b1   :  { %v433_v42 = vmax.f32 %v418_v36, 0.0  ;;  %v1451_v36 = vld [vmem:[%s2051_s5 + $0x20] sm:$0xff]  ;;  %v615_v45 = vpop.permute.xlu0 %614 }
 0x1b2   :  { %1302 = vmatmul.msk.bf16.gmra.mxu0 %vm146_vm0, %v1451_v36 }
 0x1b3   :  { %v439_v48 = vpack.c.bf16 %v433_v42, %v432_v46  ;;  %v610_v42 = vpop.permute.xlu2 %609 }
 0x1b4   :  { %v427_v27 = vpop.f32.mrf.mxu3 }
 0x1b5   :  { %v428_v29 = vadd.f32 %v427_v27, %v366_v19  ;;  %v1463_v27 = vld [vmem:[%s2026_s4] sm:$0xff]  ;;  %v625_v38 = vpop.permute.xlu1 %624 }
 0x1b7   :  { %v437_v33 = vmax.f32 %v428_v29, 0.0  ;;  %v1465_v29 = vld [vmem:[%s2026_s4 + $0x10] sm:$0xff] }
 0x1b9   :  { %v441_v37 = vpack.c.bf16 %v437_v33, %v436_v32 }
 0x1bb   :  { %534 = vmatpush.bf16.msra.mxu2 %v441_v37 }
 0x1bf   :  { %535 = vmatpush.bf16.msra.mxu2 %v440_v43  ;;  %v600_v43 = vpop.permute.xlu1 %599 }
 0x1c2   :  { %1303 = vmatmul.msk.bf16.gmra.mxu0 %vm146_vm0, %v1452_v41 }
 0x1c3   :  { %536 = vmatpush.bf16.msra.mxu2 %v439_v48 }
 0x1c7   :  { %537 = vmatpush.bf16.msra.mxu2 %v438_v50 }
 0x1ca   :  { %1342 = vmatmul.msk.bf16.vlgmr.msra.gmra.mxu2 %vm388_vm1, %v1459_v51 }
 0x1da   :  { %1343 = vmatmul.msk.bf16.gmra.mxu2 %vm388_vm1, %v1460_v52  ;;  %v605_v52 = vpop.permute.xlu2 %604 }
 0x1ea   :  { %1344 = vmatmul.msk.bf16.gmra.mxu2 %vm388_vm1, %v1461_v53 }
 0x1fa   :  { %1345 = vmatmul.msk.bf16.gmra.mxu2 %vm388_vm1, %v1462_v54 }
 0x24d   :  { %v539_v55 = vpop.f32.mrf.mxu2 }
 0x24e   :  { %v540_v21 = vadd.f32 %v539_v55, %v461_v20 }
 0x250   :  { %v559_v25 = vmax.f32 %v540_v21, 0.0 }
 0x255   :  { %v541_v56 = vpop.f32.mrf.mxu2 }
 0x256   :  { %v542_v17 = vadd.f32 %v541_v56, %v466_v16 }
 0x258   :  { %v560_v23 = vmax.f32 %v542_v17, 0.0 }
 0x25a   :  { %v567_v26 = vpack.c.bf16 %v560_v23, %v559_v25 }
 0x25d   :  { %v544_v57 = vpop.f32.mrf.mxu2 }
 0x25e   :  { %v545_v14 = vadd.f32 %v544_v57, %v471_v1 }
 0x260   :  { %v561_v22 = vmax.f32 %v545_v14, 0.0 }
 0x265   :  { %v546_v58 = vpop.f32.mrf.mxu2 }
 0x266   :  { %v547_v11 = vadd.f32 %v546_v58, %v476_v10  ;;  %v595_v58 = vpop.permute.xlu1 %594  ;;  %v1470_v10 = vld [vmem:[%s2031_s9 + $0x18] sm:$0xff] }
 0x268   :  { %v562_v18 = vmax.f32 %v547_v11, 0.0  ;;  %v224_v11 = vpop.f32.mrf.mxu0 }
 0x26a   :  { %v568_v24 = vpack.c.bf16 %v562_v18, %v561_v22 }
 0x26d   :  { %v549_v59 = vpop.f32.mrf.mxu2 }
 0x26e   :  { %v550_v7 = vadd.f32 %v549_v59, %v481_v0 }
 0x270   :  { %v563_v15 = vmax.f32 %v550_v7, 0.0  ;;  %v1454_v7 = vld [vmem:[%s2051_s5 + $0x38] sm:$0xff] }
 0x275   :  { %v551_v60 = vpop.f32.mrf.mxu2 }
 0x276   :  { %v552_v5 = vadd.f32 %v551_v60, %v486_v3 }
 0x278   :  { %v564_v12 = vmax.f32 %v552_v5, 0.0 }
 0x27a   :  { %v569_v19 = vpack.c.bf16 %v564_v12, %v563_v15  ;;  %v226_v12 = vpop.f32.mrf.mxu0 }
 0x27d   :  { %v554_v63 = vpop.f32.mrf.mxu2 }
 0x27e   :  { %v555_v2 = vadd.f32 %v554_v63, %v491_v62  ;;  %v1453_v62 = vld [vmem:[%s2051_s5 + $0x30] sm:$0xff]  ;;  %v590_v63 = vpop.permute.xlu0 %589  ;;  %s1257_s5 = sshll.u32 %s2041_s19, 4  ;;  %s1258_s5 = int_to_ptr.hbm [resolvable:$true] %s1257_s5 }
 0x27f   :  { %1304 = vmatmul.msk.bf16.gmra.mxu0 %vm146_vm0, %v1453_v62 }
 0x280   :  { %v565_v8 = vmax.f32 %v555_v2, 0.0 }
 0x282   :  { %v229_v15 = vpop.f32.mrf.mxu0 }
 0x285   :  { %v556_v4 = vpop.f32.mrf.mxu2 }
 0x286   :  { %v557_v6 = vadd.f32 %v556_v4, %v496_v61 }
 0x288   :  { %v566_v9 = vmax.f32 %v557_v6, 0.0  ;;  %v1467_v6 = vld [vmem:[%s2031_s9] sm:$0xff] }
 0x28a   :  { %v570_v13 = vpack.c.bf16 %v566_v9, %v565_v8  ;;  %v1468_v8 = vld [vmem:[%s2031_s9 + $0x8] sm:$0xff]  ;;  %v1469_v9 = vld [vmem:[%s2031_s9 + $0x10] sm:$0xff]  ;;  %v231_v17 = vpop.f32.mrf.mxu0 }
 0x28c   :  { %663 = vmatpush.bf16.msrb.mxu3 %v570_v13 }
 0x28f   :  { %1305 = vmatmul.msk.bf16.gmra.mxu0 %vm146_vm0, %v1454_v7 }
 0x290   :  { %664 = vmatpush.bf16.msrb.mxu3 %v569_v19 }
 0x294   :  { %665 = vmatpush.bf16.msrb.mxu3 %v568_v24  ;;  %v815_v24 = vpop.permute.xlu0 %814 }
 0x298   :  { %666 = vmatpush.bf16.msrb.mxu3 %v567_v26  ;;  %v810_v26 = vpop.permute.xlu2 %809 }
 0x29b   :  { %1362 = vmatmul.msk.bf16.vlgmr.msrb.gmra.mxu3 %vm388_vm1, %v1463_v27 }
 0x2ab   :  { %1363 = vmatmul.msk.bf16.gmra.mxu3 %vm388_vm1, %v1464_v28  ;;  %v800_v28 = vpop.permute.xlu1 %799 }
 0x2bb   :  { %1364 = vmatmul.msk.bf16.gmra.mxu3 %vm388_vm1, %v1465_v29 }
 0x2cb   :  { %1365 = vmatmul.msk.bf16.gmra.mxu3 %vm388_vm1, %v1466_v30  ;;  %v790_v30 = vpop.permute.xlu0 %789 }
 0x2fc   :  { %v234_v20 = vpop.f32.mrf.mxu0 }
 0x304   :  { %v236_v22 = vpop.f32.mrf.mxu0 }
 0x30c   :  { %v239_v25 = vpop.f32.mrf.mxu0 }
 0x31e   :  { %v668_v31 = vpop.f32.mrf.mxu3 }
 0x31f   :  { %v669_v0 = vadd.f32 %v668_v31, %v590_v63  ;;  %v1471_v63 = vld [vmem:[%s2032_s10] sm:$0xff] }
 0x321   :  { %v688_v4 = vmax.f32 %v669_v0, 0.0  ;;  %v1472_v0 = vld [vmem:[%s2032_s10 + $0x8] sm:$0xff] }
 0x326   :  { %v670_v32 = vpop.f32.mrf.mxu3 }
 0x327   :  { %v671_v59 = vadd.f32 %v670_v32, %v595_v58  ;;  %v241_v32 = vpop.f32.mrf.mxu0 }
 0x329   :  { %v689_v2 = vmax.f32 %v671_v59, 0.0 }
 0x32b   :  { %v696_v5 = vpack.c.bf16 %v689_v2, %v688_v4  ;;  %v1474_v2 = vld [vmem:[%s2032_s10 + $0x18] sm:$0xff] }
 0x32e   :  { %v673_v33 = vpop.f32.mrf.mxu3 }
 0x32f   :  { %v674_v56 = vadd.f32 %v673_v33, %v600_v43 }
 0x331   :  { %v690_v1 = vmax.f32 %v674_v56, 0.0 }
 0x336   :  { %v675_v34 = vpop.f32.mrf.mxu3 }
 0x337   :  { %v676_v53 = vadd.f32 %v675_v34, %v605_v52  ;;  %v785_v52 = vpop.permute.xlu0 %784 }
 0x339   :  { %v691_v60 = vmax.f32 %v676_v53, 0.0 }
 0x33b   :  { %v697_v3 = vpack.c.bf16 %v691_v60, %v690_v1  ;;  %v1473_v1 = vld [vmem:[%s2032_s10 + $0x10] sm:$0xff] }
 0x33e   :  { %v678_v35 = vpop.f32.mrf.mxu3 }
 0x33f   :  { %v679_v49 = vadd.f32 %v678_v35, %v610_v42 }
 0x341   :  { %v692_v57 = vmax.f32 %v679_v49, 0.0 }
 0x346   :  { %v680_v37 = vpop.f32.mrf.mxu3 }
 0x347   :  { %v681_v47 = vadd.f32 %v680_v37, %v615_v45  ;;  %v805_v37 = vpop.permute.xlu2 %804  ;;  %v795_v45 = vpop.permute.xlu1 %794 }
 0x349   :  { %v693_v54 = vmax.f32 %v681_v47, 0.0 }
 0x34b   :  { %v698_v61 = vpack.c.bf16 %v693_v54, %v692_v57 }
 0x34e   :  { %v683_v40 = vpop.f32.mrf.mxu3 }
 0x34f   :  { %v684_v44 = vadd.f32 %v683_v40, %v620_v39  ;;  %v780_v56 = vpop.permute.xlu2 %779 }
 0x351   :  { %v694_v50 = vmax.f32 %v684_v44, 0.0 }
 0x356   :  { %v685_v46 = vpop.f32.mrf.mxu3 }
 0x357   :  { %v686_v48 = vadd.f32 %v685_v46, %v625_v38 }
 0x359   :  { %v695_v51 = vmax.f32 %v686_v48, 0.0 }
 0x35b   :  { %v699_v55 = vpack.c.bf16 %v695_v51, %v694_v50 }
 0x35d   :  { %744 = vmatpush.bf16.msrb.mxu1 %v699_v55 }
 0x361   :  { %745 = vmatpush.bf16.msrb.mxu1 %v698_v61 }
 0x365   :  { %746 = vmatpush.bf16.msrb.mxu1 %v697_v3 }
 0x369   :  { %747 = vmatpush.bf16.msrb.mxu1 %v696_v5 }
 0x36c   :  { %1382 = vmatmul.msk.bf16.vlgmr.msrb.gmra.mxu1 %vm388_vm1, %v1467_v6 }
 0x37c   :  { %1383 = vmatmul.msk.bf16.gmra.mxu1 %vm388_vm1, %v1468_v8 }
 0x38c   :  { %1384 = vmatmul.msk.bf16.gmra.mxu1 %vm388_vm1, %v1469_v9  ;;  %v891_v9 = vpop.permute.xlu2 %890 }
 0x39c   :  { %1385 = vmatmul.msk.bf16.gmra.mxu1 %vm388_vm1, %v1470_v10  ;;  %v886_v10 = vpop.permute.xlu1 %885 }
 0x3e9   :  { %v749_v13 = vpop.f32.mrf.mxu1 }
 0x3ea   :  { %v750_v14 = vadd.f32 %v749_v13, %v224_v11  ;;  %v866_v13 = vpop.permute.xlu2 %865 }
 0x3ec   :  { %v817_v57 = vadd.f32 %v780_v56, %v750_v14 }
 0x3ee   :  { %v825_v61 = vmax.f32 %v817_v57, 0.0 }
 0x3f1   :  { %v751_v16 = vpop.f32.mrf.mxu1 }
 0x3f2   :  { %v752_v46 = vadd.f32 %v751_v16, %v226_v12  ;;  %v876_v12 = vpop.permute.xlu0 %875 }
 0x3f4   :  { %v818_v53 = vadd.f32 %v785_v52, %v752_v46 }
 0x3f6   :  { %v826_v59 = vmax.f32 %v818_v53, 0.0 }
 0x3f8   :  { %v833_v62 = vpack.c.bf16 %v826_v59, %v825_v61 }
 0x3f9   :  { %v754_v18 = vpop.f32.mrf.mxu1 }
 0x3fa   :  { %v755_v41 = vadd.f32 %v754_v18, %v229_v15  ;;  %v881_v15 = vpop.permute.xlu1 %880 }
 0x3fc   :  { %v819_v50 = vadd.f32 %v790_v30, %v755_v41  ;;  %v1477_v41 = vld [vmem:[%s2033_s11 + $0x10] sm:$0xff] }
 0x3fe   :  { %v827_v58 = vmax.f32 %v819_v50, 0.0 }
 0x401   :  { %v756_v19 = vpop.f32.mrf.mxu1 }
 0x402   :  { %v757_v38 = vadd.f32 %v756_v19, %v231_v17 }
 0x404   :  { %v820_v47 = vadd.f32 %v795_v45, %v757_v38 }
 0x406   :  { %v828_v54 = vmax.f32 %v820_v47, 0.0 }
 0x408   :  { %v834_v60 = vpack.c.bf16 %v828_v54, %v827_v58 }
 0x409   :  { %v759_v21 = vpop.f32.mrf.mxu1 }
 0x40a   :  { %v760_v34 = vadd.f32 %v759_v21, %v234_v20 }
 0x40c   :  { %v821_v42 = vadd.f32 %v800_v28, %v760_v34  ;;  %v861_v28 = vpop.permute.xlu2 %860 }
 0x40e   :  { %v829_v51 = vmax.f32 %v821_v42, 0.0  ;;  %v1478_v42 = vld [vmem:[%s2033_s11 + $0x18] sm:$0xff] }
 0x411   :  { %v761_v23 = vpop.f32.mrf.mxu1 }
 0x412   :  { %v762_v31 = vadd.f32 %v761_v23, %v236_v22  ;;  %v871_v22 = vpop.permute.xlu0 %870 }
 0x414   :  { %v822_v39 = vadd.f32 %v805_v37, %v762_v31  ;;  %v1005_v52 = vpop.permute.xlu2 %1004 }
 0x416   :  { %v830_v48 = vmax.f32 %v822_v39, 0.0  ;;  %v1475_v39 = vld [vmem:[%s2033_s11] sm:$0xff] }
 0x418   :  { %v835_v55 = vpack.c.bf16 %v830_v48, %v829_v51 }
 0x419   :  { %v764_v27 = vpop.f32.mrf.mxu1 }
 0x41a   :  { %v765_v29 = vadd.f32 %v764_v27, %v239_v25  ;;  %v1015_v50 = vpop.permute.xlu0 %1014 }
 0x41c   :  { %v823_v35 = vadd.f32 %v810_v26, %v765_v29 }
 0x41e   :  { %v831_v43 = vmax.f32 %v823_v35, 0.0 }
 0x421   :  { %v766_v33 = vpop.f32.mrf.mxu1 }
 0x422   :  { %v767_v36 = vadd.f32 %v766_v33, %v241_v32  ;;  %v856_v32 = vpop.permute.xlu1 %855 }
 0x424   :  { %v824_v40 = vadd.f32 %v815_v24, %v767_v36 }
 0x426   :  { %v832_v44 = vmax.f32 %v824_v40, 0.0  ;;  %v1476_v40 = vld [vmem:[%s2033_s11 + $0x8] sm:$0xff] }
 0x428   :  { %v836_v49 = vpack.c.bf16 %v832_v44, %v831_v43 }
 0x42a   :  { %929 = vmatpush.bf16.msrb.mxu2 %v836_v49  ;;  %v1020_v49 = vpop.permute.xlu1 %1019 }
 0x42e   :  { %930 = vmatpush.bf16.msrb.mxu2 %v835_v55  ;;  %v1010_v55 = vpop.permute.xlu0 %1009 }
 0x432   :  { %931 = vmatpush.bf16.msrb.mxu2 %v834_v60  ;;  %v995_v53 = vpop.permute.xlu1 %994 }
 0x436   :  { %932 = vmatpush.bf16.msrb.mxu2 %v833_v62  ;;  %v1000_v62 = vpop.permute.xlu2 %999 }
 0x439   :  { %1402 = vmatmul.msk.bf16.vlgmr.msrb.gmra.mxu2 %vm388_vm1, %v1471_v63 }
 0x449   :  { %1403 = vmatmul.msk.bf16.gmra.mxu2 %vm388_vm1, %v1472_v0 }
 0x459   :  { %1404 = vmatmul.msk.bf16.gmra.mxu2 %vm388_vm1, %v1473_v1 }
 0x469   :  { %1405 = vmatmul.msk.bf16.gmra.mxu2 %vm388_vm1, %v1474_v2 }
 0x4bc   :  { %v934_v3 = vpop.f32.mrf.mxu2 }
 0x4bd   :  { %v935_v33 = vadd.f32 %v934_v3, %v856_v32 }
 0x4bf   :  { %v954_v37 = vmax.f32 %v935_v33, 0.0 }
 0x4c4   :  { %v936_v4 = vpop.f32.mrf.mxu2 }
 0x4c5   :  { %v937_v29 = vadd.f32 %v936_v4, %v861_v28  ;;  %v990_v4 = vpop.permute.xlu1 %989 }
 0x4c7   :  { %v955_v35 = vmax.f32 %v937_v29, 0.0 }
 0x4c9   :  { %v962_v38 = vpack.c.bf16 %v955_v35, %v954_v37 }
 0x4cc   :  { %v939_v5 = vpop.f32.mrf.mxu2 }
 0x4cd   :  { %v940_v26 = vadd.f32 %v939_v5, %v866_v13  ;;  %v1134_v28 = vpop.permute.xlu1 %1133 }
 0x4cf   :  { %v956_v34 = vmax.f32 %v940_v26, 0.0  ;;  %v1144_v26 = vpop.permute.xlu2 %1143 }
 0x4d4   :  { %v941_v6 = vpop.f32.mrf.mxu2 }
 0x4d5   :  { %v942_v23 = vadd.f32 %v941_v6, %v871_v22 }
 0x4d7   :  { %v957_v30 = vmax.f32 %v942_v23, 0.0 }
 0x4d9   :  { %v963_v36 = vpack.c.bf16 %v957_v30, %v956_v34 }
 0x4dc   :  { %v944_v7 = vpop.f32.mrf.mxu2 }
 0x4dd   :  { %v945_v19 = vadd.f32 %v944_v7, %v876_v12 }
 0x4df   :  { %v958_v27 = vmax.f32 %v945_v19, 0.0 }
 0x4e4   :  { %v946_v8 = vpop.f32.mrf.mxu2 }
 0x4e5   :  { %v947_v17 = vadd.f32 %v946_v8, %v881_v15  ;;  %v985_v8 = vpop.permute.xlu0 %984  ;;  %v1479_v15 = vld [vmem:[%s2034_s12] sm:$0xff] }
 0x4e7   :  { %v959_v24 = vmax.f32 %v947_v17, 0.0  ;;  %v1481_v17 = vld [vmem:[%s2034_s12 + $0x10] sm:$0xff] }
 0x4e9   :  { %v964_v31 = vpack.c.bf16 %v959_v24, %v958_v27 }
 0x4ec   :  { %v949_v11 = vpop.f32.mrf.mxu2 }
 0x4ed   :  { %v950_v14 = vadd.f32 %v949_v11, %v886_v10 }
 0x4ef   :  { %v960_v20 = vmax.f32 %v950_v14, 0.0 }
 0x4f4   :  { %v951_v16 = vpop.f32.mrf.mxu2 }
 0x4f5   :  { %v952_v18 = vadd.f32 %v951_v16, %v891_v9  ;;  %v1480_v16 = vld [vmem:[%s2034_s12 + $0x8] sm:$0xff] }
 0x4f7   :  { %v961_v21 = vmax.f32 %v952_v18, 0.0  ;;  %v1482_v18 = vld [vmem:[%s2034_s12 + $0x18] sm:$0xff] }
 0x4f9   :  { %v965_v25 = vpack.c.bf16 %v961_v21, %v960_v20 }
 0x4fb   :  { %1058 = vmatpush.bf16.msra.mxu3 %v965_v25  ;;  %v1149_v25 = vpop.permute.xlu0 %1148 }
 0x4ff   :  { %1059 = vmatpush.bf16.msra.mxu3 %v964_v31  ;;  %v1139_v31 = vpop.permute.xlu2 %1138 }
 0x503   :  { %1060 = vmatpush.bf16.msra.mxu3 %v963_v36  ;;  %v1124_v29 = vpop.permute.xlu0 %1123 }
 0x507   :  { %1061 = vmatpush.bf16.msra.mxu3 %v962_v38  ;;  %v1129_v38 = vpop.permute.xlu1 %1128 }
 0x50a   :  { %1422 = vmatmul.msk.bf16.vlgmr.msra.gmra.mxu3 %vm388_vm1, %v1475_v39 }
 0x51a   :  { %1423 = vmatmul.msk.bf16.gmra.mxu3 %vm388_vm1, %v1476_v40 }
 0x52a   :  { %1424 = vmatmul.msk.bf16.gmra.mxu3 %vm388_vm1, %v1477_v41 }
 0x53a   :  { %1425 = vmatmul.msk.bf16.gmra.mxu3 %vm388_vm1, %v1478_v42 }
 0x58d   :  { %v1063_v43 = vpop.f32.mrf.mxu3 }
 0x58e   :  { %v1064_v9 = vadd.f32 %v1063_v43, %v985_v8 }
 0x590   :  { %v1083_v13 = vmax.f32 %v1064_v9, 0.0 }
 0x595   :  { %v1065_v44 = vpop.f32.mrf.mxu3 }
 0x596   :  { %v1066_v5 = vadd.f32 %v1065_v44, %v990_v4  ;;  %v1119_v44 = vpop.permute.xlu0 %1118 }
 0x598   :  { %v1084_v11 = vmax.f32 %v1066_v5, 0.0 }
 0x59a   :  { %v1091_v14 = vpack.c.bf16 %v1084_v11, %v1083_v13 }
 0x59d   :  { %v1068_v45 = vpop.f32.mrf.mxu3 }
 0x59e   :  { %v1069_v2 = vadd.f32 %v1068_v45, %v995_v53 }
 0x5a0   :  { %v1085_v10 = vmax.f32 %v1069_v2, 0.0 }
 0x5a5   :  { %v1070_v46 = vpop.f32.mrf.mxu3 }
 0x5a6   :  { %v1071_v63 = vadd.f32 %v1070_v46, %v1000_v62 }
 0x5a8   :  { %v1086_v6 = vmax.f32 %v1071_v63, 0.0 }
 0x5aa   :  { %v1092_v12 = vpack.c.bf16 %v1086_v6, %v1085_v10 }
 0x5ad   :  { %v1073_v47 = vpop.f32.mrf.mxu3 }
 0x5ae   :  { %v1074_v59 = vadd.f32 %v1073_v47, %v1005_v52 }
 0x5b0   :  { %v1087_v3 = vmax.f32 %v1074_v59, 0.0 }
 0x5b5   :  { %v1075_v48 = vpop.f32.mrf.mxu3 }
 0x5b6   :  { %v1076_v57 = vadd.f32 %v1075_v48, %v1010_v55  ;;  %v1114_v48 = vpop.permute.xlu2 %1113  ;;  %v1224_v55 = vld [vmem:[%s2039_s17] sm:$0x1] }
 0x5b8   :  { %v1088_v0 = vmax.f32 %v1076_v57, 0.0 }
 0x5ba   :  { %v1093_v7 = vpack.c.bf16 %v1088_v0, %v1087_v3 }
 0x5bd   :  { %v1078_v51 = vpop.f32.mrf.mxu3 }
 0x5be   :  { %v1079_v54 = vadd.f32 %v1078_v51, %v1015_v50 }
 0x5c0   :  { %v1089_v60 = vmax.f32 %v1079_v54, 0.0 }
 0x5c5   :  { %v1080_v56 = vpop.f32.mrf.mxu3 }
 0x5c6   :  { %v1081_v58 = vadd.f32 %v1080_v56, %v1020_v49  ;;  %v1229_v56 = vpop.permute.xlu1 %1228 }
 0x5c7   :  { %v1231_v57 = vperm.slane %v1229_v56, 0 }
 0x5c8   :  { %v1090_v61 = vmax.f32 %v1081_v58, 0.0 }
 0x5ca   :  { %v1094_v1 = vpack.c.bf16 %v1090_v61, %v1089_v60 }
 0x5cc   :  { %1187 = vmatpush.bf16.msra.mxu1 %v1094_v1 }
 0x5d0   :  { %1188 = vmatpush.bf16.msra.mxu1 %v1093_v7 }
 0x5d4   :  { %1189 = vmatpush.bf16.msra.mxu1 %v1092_v12 }
 0x5d8   :  { %1190 = vmatpush.bf16.msra.mxu1 %v1091_v14 }
 0x5db   :  { %1442 = vmatmul.msk.bf16.vlgmr.msra.gmra.mxu1 %vm388_vm1, %v1479_v15 }
 0x5eb   :  { %1443 = vmatmul.msk.bf16.gmra.mxu1 %vm388_vm1, %v1480_v16 }
 0x5fb   :  { %1444 = vmatmul.msk.bf16.gmra.mxu1 %vm388_vm1, %v1481_v17 }
 0x60b   :  { %1445 = vmatmul.msk.bf16.gmra.mxu1 %vm388_vm1, %v1482_v18 }
 0x658   :  { %v1192_v19 = vpop.f32.mrf.mxu1 }
 0x659   :  { %v1193_v49 = vadd.f32 %v1192_v19, %v1114_v48 }
 0x65b   :  { %v1212_v53 = vmax.f32 %v1193_v49, 0.0 }
 0x660   :  { %v1194_v20 = vpop.f32.mrf.mxu1 }
 0x661   :  { %v1195_v45 = vadd.f32 %v1194_v20, %v1119_v44 }
 0x663   :  { %v1213_v51 = vmax.f32 %v1195_v45, 0.0 }
 0x665   :  { %v1220_v54 = vpack.c.bf16 %v1213_v51, %v1212_v53 }
 0x668   :  { %v1197_v21 = vpop.f32.mrf.mxu1 }
 0x669   :  { %v1198_v42 = vadd.f32 %v1197_v21, %v1124_v29 }
 0x66b   :  { %v1214_v50 = vmax.f32 %v1198_v42, 0.0 }
 0x670   :  { %v1199_v22 = vpop.f32.mrf.mxu1 }
 0x671   :  { %v1200_v39 = vadd.f32 %v1199_v22, %v1129_v38 }
 0x673   :  { %v1215_v46 = vmax.f32 %v1200_v39, 0.0 }
 0x675   :  { %v1221_v52 = vpack.c.bf16 %v1215_v46, %v1214_v50 }
 0x678   :  { %v1202_v23 = vpop.f32.mrf.mxu1 }
 0x679   :  { %v1203_v35 = vadd.f32 %v1202_v23, %v1134_v28 }
 0x67b   :  { %v1216_v43 = vmax.f32 %v1203_v35, 0.0 }
 0x680   :  { %v1204_v24 = vpop.f32.mrf.mxu1 }
 0x681   :  { %v1205_v33 = vadd.f32 %v1204_v24, %v1139_v31 }
 0x683   :  { %v1217_v40 = vmax.f32 %v1205_v33, 0.0 }
 0x685   :  { %v1222_v47 = vpack.c.bf16 %v1217_v40, %v1216_v43 }
 0x688   :  { %v1207_v27 = vpop.f32.mrf.mxu1 }
 0x689   :  { %v1208_v30 = vadd.f32 %v1207_v27, %v1144_v26 }
 0x68b   :  { %v1218_v36 = vmax.f32 %v1208_v30, 0.0 }
 0x690   :  { %v1209_v32 = vpop.f32.mrf.mxu1 }
 0x691   :  { %v1210_v34 = vadd.f32 %v1209_v32, %v1149_v25 }
 0x693   :  { %v1219_v37 = vmax.f32 %v1210_v34, 0.0 }
 0x695   :  { %v1223_v41 = vpack.c.bf16 %v1219_v37, %v1218_v36 }
 0x697   :  { %1239 = vmatpush.bf16.msra.mxu2 %v1223_v41 }
 0x69b   :  { %1240 = vmatpush.bf16.msra.mxu2 %v1222_v47 }
 0x69f   :  { %1241 = vmatpush.bf16.msra.mxu2 %v1221_v52 }
 0x6a3   :  { %1242 = vmatpush.bf16.msra.mxu2 %v1220_v54 }
 0x6a6   :  { %1446 = vmatmul.msk.bf16.vlgmr.msra.gmra.mxu2 %vm388_vm1, %v1224_v55 }
 0x729   :  { %v1244_v58 = vpop.f32.mrf.mxu2 }
 0x72a   :  { %v1245_v59 = vadd.f32 %v1244_v58, %v1231_v57 }
 0x72c   :  { %v1248_v60 = vand.u32 2147483647, %v1245_v59 }
 0x72e   :  { %1249 = vst [vmem:[#allocation3] sm:$0x1] %v1248_v60 }
 0x72f   :  { %1260 = dma.vmem_to_hbm [thread:$0]  %s1256_s15, 16, %s1258_s5, [#allocation4]  }
 0x731   :  { %v1246_v61 = vpop.f32.mrf.mxu2 }
 0x732   :  { %1516 = dma.done.wait [#allocation4], 16  }
 0x733   :  { %1517 = vsyncadd [#allocation4], 4294967280 }
 0x734   :  { %1265 = vsyncpa [#allocation4], 1 }

</bundles_post_ra>
